<compile_context>
chip_gen: v6e
topology: v6e:2x2x1
jax: 0.10.0
libtpu: 0.0.40
codegen_flags: <defaults>
</compile_context>

<pallas_src>
import functools

import jax
import jax.numpy as jnp
from jax.experimental import pallas as pl
from jax.experimental.pallas import tpu as pltpu


def _round_up(x, m):
    return (x + m - 1) // m * m


# ---------------------------------------------------------------------------
# Pass 1: hoisted input projection  Z = X @ W_xh + b_h   (time-independent)
# ---------------------------------------------------------------------------
def _proj_kernel(x_ref, wxh_ref, bh_ref, z_ref):
    # x_ref: (chunk_rows, D_in)  mxu dtype
    # wxh_ref: (D_in, H_pad)     mxu dtype
    # bh_ref: (1, H_pad)         f32
    # z_ref: (chunk_rows, H_pad) f32
    z_ref[...] = (
        jnp.dot(x_ref[...], wxh_ref[...], preferred_element_type=jnp.float32)
        + bh_ref[...]
    )


# ---------------------------------------------------------------------------
# Pass 2: sequential recurrence  h_t = tanh(h_{t-1} @ W_hh + Z_t)
# ---------------------------------------------------------------------------
def _recurrence_kernel(z_ref, whh_ref, out_ref, state_ref, *, b_pad):
    # z_ref/out_ref: (TT * b_pad, H_pad) f32  — lane/sublane-dense time chunk
    # whh_ref:       (H_pad, H_pad)      mxu dtype (resident)
    # state_ref:     (b_pad, H_pad)      f32 resident output block = carried h
    @pl.when(pl.program_id(0) == 0)
    def _():
        state_ref[...] = jnp.zeros_like(state_ref)   # module's `state is None`

    whh = whh_ref[...]
    tt = z_ref.shape[0] // b_pad

    def body(i, h):
        r = pl.multiple_of(i * b_pad, b_pad)
        new_h = jnp.tanh(
            jnp.dot(h.astype(whh.dtype), whh,
                    preferred_element_type=jnp.float32)
            + z_ref[pl.ds(r, b_pad), :]
        )
        out_ref[pl.ds(r, b_pad), :] = new_h
        return new_h

    state_ref[...] = jax.lax.fori_loop(0, tt, body, state_ref[...],
                                       unroll=True)


# ---------------------------------------------------------------------------
# Wrapper
# ---------------------------------------------------------------------------
@functools.partial(jax.jit, static_argnames=("tt", "mxu_dtype"))
def rnn_scratch_forward(inputs, W_xh, W_hh, b_h, *, tt=None,
                        mxu_dtype=jnp.bfloat16):
    """inputs: (T, B, D_in) f32 -> (outputs (T, B, H), final_state (B, H))."""
    T, B, D_in = inputs.shape
    H = W_xh.shape[1]

    B_pad = _round_up(B, 8)      # sublane alignment
    H_pad = _round_up(H, 128)    # lane-dense stores

    # Time-chunk size (must divide T to keep index maps trivial).
    tt = tt or min(T, 32)
    while T % tt:
        tt -= 1

    # ---- pad & cast (done once, in XLA) ------------------------------------
    x_p = jnp.zeros((T, B_pad, D_in), jnp.float32).at[:, :B, :].set(inputs)
    x_flat = x_p.reshape(T * B_pad, D_in).astype(mxu_dtype)

    wxh_p = (jnp.zeros((D_in, H_pad), jnp.float32)
             .at[:, :H].set(W_xh).astype(mxu_dtype))
    whh_p = (jnp.zeros((H_pad, H_pad), jnp.float32)
             .at[:H, :H].set(W_hh).astype(mxu_dtype))
    bh_p = jnp.zeros((1, H_pad), jnp.float32).at[0, :H].set(b_h)

    rows = T * B_pad
    chunk_rows = tt * B_pad
    n_chunks = T // tt

    # ---- pass 1: batched input projection (parallel over time chunks) ------
    z = pl.pallas_call(
        _proj_kernel,
        grid_spec=pltpu.PrefetchScalarGridSpec(
            num_scalar_prefetch=0,
            grid=(n_chunks,),
            in_specs=[
                pl.BlockSpec((chunk_rows, D_in), lambda c: (c, 0)),   # X chunk
                pl.BlockSpec((D_in, H_pad), lambda c: (0, 0)),        # W_xh
                pl.BlockSpec((1, H_pad), lambda c: (0, 0)),           # b_h
            ],
            out_specs=pl.BlockSpec((chunk_rows, H_pad), lambda c: (c, 0)),
        ),
        out_shape=jax.ShapeDtypeStruct((rows, H_pad), jnp.float32),
        compiler_params=pltpu.CompilerParams(
            dimension_semantics=("parallel",)),
    )(x_flat, wxh_p, bh_p)

    # ---- pass 2: sequential recurrence, time axis chunked -------------------
    outputs_flat, final_pad = pl.pallas_call(
        functools.partial(_recurrence_kernel, b_pad=B_pad),
        grid_spec=pltpu.PrefetchScalarGridSpec(
            num_scalar_prefetch=0,
            grid=(n_chunks,),
            in_specs=[
                pl.BlockSpec((chunk_rows, H_pad), lambda c: (c, 0)),  # Z chunk
                pl.BlockSpec((H_pad, H_pad), lambda c: (0, 0)),       # W_hh
            ],
            out_specs=[
                pl.BlockSpec((chunk_rows, H_pad), lambda c: (c, 0)),  # outputs
                pl.BlockSpec((B_pad, H_pad), lambda c: (0, 0)),       # carry/final
            ],
        ),
        out_shape=(
            jax.ShapeDtypeStruct((rows, H_pad), jnp.float32),
            jax.ShapeDtypeStruct((B_pad, H_pad), jnp.float32),
        ),
        compiler_params=pltpu.CompilerParams(
            dimension_semantics=("arbitrary",)),      # true recurrence
    )(z, whh_p)

    outputs = outputs_flat.reshape(T, B_pad, H_pad)[:, :B, :H]
    final_state = final_pad[:B, :H]
    return outputs, final_state


# ---------------------------------------------------------------------------
# Pure-JAX reference mirroring the PyTorch loop
# ---------------------------------------------------------------------------
def rnn_scratch_reference(inputs, W_xh, W_hh, b_h):
    B = inputs.shape[1]
    H = W_xh.shape[1]

    def step(state, x):
        new_state = jnp.tanh(x @ W_xh + state @ W_hh + b_h)
        return new_state, new_state

    init = jnp.zeros((B, H), dtype=jnp.float32)
    final_state, outputs = jax.lax.scan(step, init, inputs)
    return outputs, final_state


if __name__ == "__main__":
    # Small shapes consistent with the module: seq=8, batch=4, inputs=16, hidden=32.
    T, B, D_IN, H = 8, 4, 16, 32
    sigma = 0.01

    key = jax.random.PRNGKey(0)
    k_x, k_wxh, k_whh = jax.random.split(key, 3)

    inputs = jax.random.normal(k_x, (T, B, D_IN), dtype=jnp.float32)
    W_xh = jax.random.normal(k_wxh, (D_IN, H), dtype=jnp.float32) * sigma
    W_hh = jax.random.normal(k_whh, (H, H), dtype=jnp.float32) * sigma
    b_h = jnp.zeros((H,), dtype=jnp.float32)

    ref_outputs, ref_final = rnn_scratch_reference(inputs, W_xh, W_hh, b_h)

    # Exact-semantics check: f32 end-to-end through the MXU.
    out_f32, fin_f32 = rnn_scratch_forward(inputs, W_xh, W_hh, b_h,
                                           tt=4, mxu_dtype=jnp.float32)
    jax.block_until_ready((out_f32, fin_f32))
    assert jnp.allclose(out_f32, ref_outputs, atol=1e-5, rtol=1e-5)
    assert jnp.allclose(fin_f32, ref_final, atol=1e-5, rtol=1e-5)

    # Fast path: bf16 at the MXU inputs, f32 accumulate + f32 elementwise.
    out_bf, fin_bf = rnn_scratch_forward(inputs, W_xh, W_hh, b_h,
                                         tt=4, mxu_dtype=jnp.bfloat16)
    jax.block_until_ready((out_bf, fin_bf))
    assert jnp.allclose(out_bf, ref_outputs, atol=2e-3, rtol=2e-2)
    assert jnp.allclose(fin_bf, ref_final, atol=2e-3, rtol=2e-2)

    print("KERNEL_OK")
</pallas_src>

<mosaic_0001>
module attributes {stable_mosaic.version = 11 : i64} {
  func.func @_proj_kernel(%arg0: i32, %arg1: memref<32x16xf32, #tpu.memory_space<vmem>>, %arg2: memref<16x128xf32, #tpu.memory_space<vmem>>, %arg3: memref<1x128xf32, #tpu.memory_space<vmem>>, %arg4: memref<32x128xf32, #tpu.memory_space<vmem>>) attributes {dimension_semantics = [#tpu.dimension_semantics<parallel>], iteration_bounds = array<i64: 2>, scalar_prefetch = 0 : i64, scratch_operands = 0 : i64, tpu.core_type = #tpu.core_type<tc>, window_params = [{transform_indices = @transform_0, window_bounds = array<i64: 32, 16>}, {pipeline_mode = #tpu.pipeline_mode<synchronous>, transform_indices = @transform_1, window_bounds = array<i64: 16, 128>}, {pipeline_mode = #tpu.pipeline_mode<synchronous>, transform_indices = @transform_2, window_bounds = array<i64: 1, 128>}, {transform_indices = @transform_3, window_bounds = array<i64: 32, 128>}]} {
    %c0 = arith.constant 0 : index
    %c0_0 = arith.constant 0 : index
    %0 = vector.load %arg1[%c0, %c0_0] : memref<32x16xf32, #tpu.memory_space<vmem>>, vector<32x16xf32>
    %c0_1 = arith.constant 0 : index
    %c0_2 = arith.constant 0 : index
    %1 = vector.load %arg2[%c0_1, %c0_2] : memref<16x128xf32, #tpu.memory_space<vmem>>, vector<16x128xf32>
    %cst = arith.constant dense<0.000000e+00> : vector<32x128xf32>
    %2 = tpu.matmul %0, %1, %cst {dimension_numbers = #tpu.dot_dimension_numbers<[1], [0], [0], [1], [0, 0, 1, 1], [], []>} : vector<32x16xf32>, vector<16x128xf32>, vector<32x128xf32> -> vector<32x128xf32>
    %c0_3 = arith.constant 0 : index
    %c0_4 = arith.constant 0 : index
    %3 = vector.load %arg3[%c0_3, %c0_4] : memref<1x128xf32, #tpu.memory_space<vmem>>, vector<1x128xf32>
    %4 = vector.broadcast %3 : vector<1x128xf32> to vector<32x128xf32>
    %5 = arith.addf %2, %4 : vector<32x128xf32>
    %c0_5 = arith.constant 0 : index
    %c0_6 = arith.constant 0 : index
    %6 = vector.load %arg4[%c0_5, %c0_6] : memref<32x128xf32, #tpu.memory_space<vmem>>, vector<32x128xf32>
    tpu.vector_store %arg4[%c0_5, %c0_6], %5 {strides = array<i32>} : memref<32x128xf32, #tpu.memory_space<vmem>>, vector<32x128xf32>,
    return
  }
  func.func @transform_0(%arg0: i32) -> (i32, i32) {
    %c0_i32 = arith.constant 0 : i32
    %c0_i32_0 = arith.constant 0 : i32
    return %arg0, %c0_i32 : i32, i32
  }
  func.func @transform_1(%arg0: i32) -> (i32, i32) {
    %c0_i32 = arith.constant 0 : i32
    %c0_i32_0 = arith.constant 0 : i32
    %c0_i32_1 = arith.constant 0 : i32
    return %c0_i32, %c0_i32_0 : i32, i32
  }
  func.func @transform_2(%arg0: i32) -> (i32, i32) {
    %c0_i32 = arith.constant 0 : i32
    %c0_i32_0 = arith.constant 0 : i32
    %c0_i32_1 = arith.constant 0 : i32
    return %c0_i32, %c0_i32_0 : i32, i32
  }
  func.func @transform_3(%arg0: i32) -> (i32, i32) {
    %c0_i32 = arith.constant 0 : i32
    %c0_i32_0 = arith.constant 0 : i32
    return %arg0, %c0_i32 : i32, i32
  }
}

module attributes {stable_mosaic.version = 11 : i64} {
  func.func @_recurrence_kernel(%arg0: i32, %arg1: memref<32x128xf32, #tpu.memory_space<vmem>>, %arg2: memref<128x128xf32, #tpu.memory_space<vmem>>, %arg3: memref<32x128xf32, #tpu.memory_space<vmem>>, %arg4: memref<8x128xf32, #tpu.memory_space<vmem>>) attributes {dimension_semantics = [#tpu.dimension_semantics<arbitrary>], iteration_bounds = array<i64: 2>, scalar_prefetch = 0 : i64, scratch_operands = 0 : i64, tpu.core_type = #tpu.core_type<tc>, window_params = [{transform_indices = @transform_0, window_bounds = array<i64: 32, 128>}, {pipeline_mode = #tpu.pipeline_mode<synchronous>, transform_indices = @transform_1, window_bounds = array<i64: 128, 128>}, {transform_indices = @transform_2, window_bounds = array<i64: 32, 128>}, {pipeline_mode = #tpu.pipeline_mode<synchronous>, transform_indices = @transform_3, window_bounds = array<i64: 8, 128>}]} {
    %c0_i32 = arith.constant 0 : i32
    %0 = arith.cmpi eq, %arg0, %c0_i32 : i32
    %1 = arith.extui %0 : i1 to i32
    %c0_i32_0 = arith.constant 0 : i32
    %2 = arith.cmpi ne, %1, %c0_i32_0 : i32
    scf.if %2 {
      %cst_21 = arith.constant 0.000000e+00 : f32
      %42 = vector.broadcast %cst_21 : f32 to vector<8x128xf32>
      %c0_22 = arith.constant 0 : index
      %c0_23 = arith.constant 0 : index
      %43 = vector.load %arg4[%c0_22, %c0_23] : memref<8x128xf32, #tpu.memory_space<vmem>>, vector<8x128xf32>
      tpu.vector_store %arg4[%c0_22, %c0_23], %42 {strides = array<i32>} : memref<8x128xf32, #tpu.memory_space<vmem>>, vector<8x128xf32>,
    } else {
    }
    %c0 = arith.constant 0 : index
    %c0_1 = arith.constant 0 : index
    %3 = vector.load %arg2[%c0, %c0_1] : memref<128x128xf32, #tpu.memory_space<vmem>>, vector<128x128xf32>
    %c0_2 = arith.constant 0 : index
    %c0_3 = arith.constant 0 : index
    %4 = vector.load %arg4[%c0_2, %c0_3] : memref<8x128xf32, #tpu.memory_space<vmem>>, vector<8x128xf32>
    %c0_i32_4 = arith.constant 0 : i32
    %c8_i32 = arith.constant 8 : i32
    %5 = arith.muli %c0_i32_4, %c8_i32 : i32
    %6 = tpu.assume_multiple %5, 8 : i32
    %cst = arith.constant dense<0.000000e+00> : vector<8x128xf32>
    %7 = tpu.matmul %4, %3, %cst {dimension_numbers = #tpu.dot_dimension_numbers<[1], [0], [0], [1], [0, 0, 1, 1], [], []>} : vector<8x128xf32>, vector<128x128xf32>, vector<8x128xf32> -> vector<8x128xf32>
    %8 = arith.index_cast %6 : i32 to index
    %c0_5 = arith.constant 0 : index
    %9 = vector.load %arg1[%8, %c0_5] : memref<32x128xf32, #tpu.memory_space<vmem>>, vector<8x128xf32>
    %10 = arith.addf %7, %9 : vector<8x128xf32>
    %11 = math.tanh %10 : vector<8x128xf32>
    %12 = arith.index_cast %6 : i32 to index
    %c0_6 = arith.constant 0 : index
    %13 = vector.load %arg3[%12, %c0_6] : memref<32x128xf32, #tpu.memory_space<vmem>>, vector<8x128xf32>
    tpu.vector_store %arg3[%12, %c0_6], %11 {strides = array<i32>} : memref<32x128xf32, #tpu.memory_space<vmem>>, vector<8x128xf32>,
    %c1_i32 = arith.constant 1 : i32
    %c8_i32_7 = arith.constant 8 : i32
    %14 = arith.muli %c1_i32, %c8_i32_7 : i32
    %15 = tpu.assume_multiple %14, 8 : i32
    %cst_8 = arith.constant dense<0.000000e+00> : vector<8x128xf32>
    %16 = tpu.matmul %11, %3, %cst_8 {dimension_numbers = #tpu.dot_dimension_numbers<[1], [0], [0], [1], [0, 0, 1, 1], [], []>} : vector<8x128xf32>, vector<128x128xf32>, vector<8x128xf32> -> vector<8x128xf32>
    %17 = arith.index_cast %15 : i32 to index
    %c0_9 = arith.constant 0 : index
    %18 = vector.load %arg1[%17, %c0_9] : memref<32x128xf32, #tpu.memory_space<vmem>>, vector<8x128xf32>
    %19 = arith.addf %16, %18 : vector<8x128xf32>
    %20 = math.tanh %19 : vector<8x128xf32>
    %21 = arith.index_cast %15 : i32 to index
    %c0_10 = arith.constant 0 : index
    %22 = vector.load %arg3[%21, %c0_10] : memref<32x128xf32, #tpu.memory_space<vmem>>, vector<8x128xf32>
    tpu.vector_store %arg3[%21, %c0_10], %20 {strides = array<i32>} : memref<32x128xf32, #tpu.memory_space<vmem>>, vector<8x128xf32>,
    %c2_i32 = arith.constant 2 : i32
    %c8_i32_11 = arith.constant 8 : i32
    %23 = arith.muli %c2_i32, %c8_i32_11 : i32
    %24 = tpu.assume_multiple %23, 8 : i32
    %cst_12 = arith.constant dense<0.000000e+00> : vector<8x128xf32>
    %25 = tpu.matmul %20, %3, %cst_12 {dimension_numbers = #tpu.dot_dimension_numbers<[1], [0], [0], [1], [0, 0, 1, 1], [], []>} : vector<8x128xf32>, vector<128x128xf32>, vector<8x128xf32> -> vector<8x128xf32>
    %26 = arith.index_cast %24 : i32 to index
    %c0_13 = arith.constant 0 : index
    %27 = vector.load %arg1[%26, %c0_13] : memref<32x128xf32, #tpu.memory_space<vmem>>, vector<8x128xf32>
    %28 = arith.addf %25, %27 : vector<8x128xf32>
    %29 = math.tanh %28 : vector<8x128xf32>
    %30 = arith.index_cast %24 : i32 to index
    %c0_14 = arith.constant 0 : index
    %31 = vector.load %arg3[%30, %c0_14] : memref<32x128xf32, #tpu.memory_space<vmem>>, vector<8x128xf32>
    tpu.vector_store %arg3[%30, %c0_14], %29 {strides = array<i32>} : memref<32x128xf32, #tpu.memory_space<vmem>>, vector<8x128xf32>,
    %c3_i32 = arith.constant 3 : i32
    %c8_i32_15 = arith.constant 8 : i32
    %32 = arith.muli %c3_i32, %c8_i32_15 : i32
    %33 = tpu.assume_multiple %32, 8 : i32
    %cst_16 = arith.constant dense<0.000000e+00> : vector<8x128xf32>
    %34 = tpu.matmul %29, %3, %cst_16 {dimension_numbers = #tpu.dot_dimension_numbers<[1], [0], [0], [1], [0, 0, 1, 1], [], []>} : vector<8x128xf32>, vector<128x128xf32>, vector<8x128xf32> -> vector<8x128xf32>
    %35 = arith.index_cast %33 : i32 to index
    %c0_17 = arith.constant 0 : index
    %36 = vector.load %arg1[%35, %c0_17] : memref<32x128xf32, #tpu.memory_space<vmem>>, vector<8x128xf32>
    %37 = arith.addf %34, %36 : vector<8x128xf32>
    %38 = math.tanh %37 : vector<8x128xf32>
    %39 = arith.index_cast %33 : i32 to index
    %c0_18 = arith.constant 0 : index
    %40 = vector.load %arg3[%39, %c0_18] : memref<32x128xf32, #tpu.memory_space<vmem>>, vector<8x128xf32>
    tpu.vector_store %arg3[%39, %c0_18], %38 {strides = array<i32>} : memref<32x128xf32, #tpu.memory_space<vmem>>, vector<8x128xf32>,
    %c4_i32 = arith.constant 4 : i32
    %c0_19 = arith.constant 0 : index
    %c0_20 = arith.constant 0 : index
    %41 = vector.load %arg4[%c0_19, %c0_20] : memref<8x128xf32, #tpu.memory_space<vmem>>, vector<8x128xf32>
    tpu.vector_store %arg4[%c0_19, %c0_20], %38 {strides = array<i32>} : memref<8x128xf32, #tpu.memory_space<vmem>>, vector<8x128xf32>,
    return
  }
  func.func @transform_0(%arg0: i32) -> (i32, i32) {
    %c0_i32 = arith.constant 0 : i32
    %c0_i32_0 = arith.constant 0 : i32
    return %arg0, %c0_i32 : i32, i32
  }
  func.func @transform_1(%arg0: i32) -> (i32, i32) {
    %c0_i32 = arith.constant 0 : i32
    %c0_i32_0 = arith.constant 0 : i32
    %c0_i32_1 = arith.constant 0 : i32
    return %c0_i32, %c0_i32_0 : i32, i32
  }
  func.func @transform_2(%arg0: i32) -> (i32, i32) {
    %c0_i32 = arith.constant 0 : i32
    %c0_i32_0 = arith.constant 0 : i32
    return %arg0, %c0_i32 : i32, i32
  }
  func.func @transform_3(%arg0: i32) -> (i32, i32) {
    %c0_i32 = arith.constant 0 : i32
    %c0_i32_0 = arith.constant 0 : i32
    %c0_i32_1 = arith.constant 0 : i32
    return %c0_i32, %c0_i32_0 : i32, i32
  }
}

</mosaic_0001>

<bundles_post_ra>
// kernel: rnn_scratch_forward.2
= control target key start
LH: loop header
LB: loop body
LE: loop exit
PB: predicated region body
PF: predicated region fallthrough
CT: control target
= control target key end

     0   :  { %s417_s12 = smov 0   ;;  %s443_s0 = inlined_call_operand.vmem [shape: f32[64,16], index: 0, kind: input, shape index: {}]   ;;  %s444_s1 = inlined_call_operand.vmem [shape: f32[16,128], index: 1, kind: input, shape index: {}]   ;;  %s445_s2 = inlined_call_operand.vmem [shape: f32[1,128], index: 2, kind: input, shape index: {}]   ;;  %s446_s3 = inlined_call_operand.vmem [shape: f32[64,128], index: 3, kind: output, shape index: {}]  }
   0x1 LB: > { %s345_s13 = sadd.s32 4294967295, %s395_s12   ;;  %p349_p0 = scmp.ge.s32.totalorder %s395_s12, 1  ;;  %s395_s12 = sphi %s417_s12, %s13_s12  }
   0x2   : > { %p138_p1 = scmp.lt.s32.totalorder %s395_s12, 3 }
   0x4   : > { %p139_p2 = pnand %p349_p0, %p138_p1 }
   0x5   : > { %s350_s18 = sshll.u32 (!%p139_p2), %s345_s13, 2 }
   0x6   : > { %142 = sbr.rel (%p139_p2) target bundleno = 215 (0xd7), region = 32  ;;  %p163_p3 = scmp.lt.s32.totalorder (!%p139_p2), %s350_s18, 7 }
   0xb   : > { %v179_v0 = vld [vmem:[%s444_s1 + $0x8] sm:$0xff]  ;;  %v178_v1 = vld [vmem:[%s444_s1] sm:$0xff]  ;;  %s448_s18 = smov (!%p163_p3, %s350_s18), 7  ;;  %vm187_vm0 = vcmask 130048  }
   0xc   : > { %367 = vmatprep.subr.mxu0 %v179_v0  ;;  %377 = vmatprep.subr.mxu1 %v179_v0  ;;  %s351_s19 = sshll.u32 %s448_s18, 3  ;;  %v354_v8 = vld [vmem:[%s445_s2] ss:$0 sm:$0xff] }
   0xd   : > { %368 = vmatpush3.msra.mxu0 %v179_v0  ;;  %379 = vmatpush3.msra.mxu1 %v179_v0  ;;  %s166_s22 = scalar_lea.vmem %s443_s0, %s351_s19  ;;  %s172_s27 = scalar_lea.vmem %s446_s3, %s351_s19 }
   0xe   : > { %369 = vmatprep.subr.mxu0 %v178_v1  ;;  %378 = vmatprep.subr.mxu1 %v178_v1  ;;  %v174_v2 = vld [vmem:[%s166_s22] sm:$0xff]  ;;  %v176_v3 = vld [vmem:[%s166_s22 + $0x10] sm:$0xff]  ;;  %v175_v4 = vld [vmem:[%s166_s22 + $0x8] sm:$0xff] }
   0xf   : > { %370 = vmatpush3.msra.mxu0 %v178_v1  ;;  %380 = vmatpush3.msra.mxu1 %v178_v1  ;;  %v177_v5 = vld [vmem:[%s166_s22 + $0x18] sm:$0xff] }
  0x10   : > { %371 = vmatprep.mubr.msk.f32.mxu0 %vm187_vm0, %v174_v2  ;;  %374 = vmatprep.mubr.msk.f32.mxu1 %vm187_vm0, %v176_v3 }
  0x11   : > { %372 = vmatmul.mubr.msk.f32.vlgmr.msra.gmra.mxu0 %vm187_vm0, %v175_v4  ;;  %375 = vmatmul.mubr.msk.f32.vlgmr.msra.gmra.mxu1 %vm187_vm0, %v177_v5 }
  0xd1   : > { %v373_v6 = vpop.f32.mrf.mxu0  ;;  %v376_v7 = vpop.f32.mrf.mxu1 }
  0xd2   : > { %v272_v12 = vadd.f32 %v373_v6, %v354_v8  ;;  %v282_v14 = vadd.f32 %v376_v7, %v354_v8 }
  0xd3   : > { %v266_v9 = vpop.f32.mrf.mxu0  ;;  %v276_v10 = vpop.f32.mrf.mxu1 }
  0xd4   : > { %v267_v11 = vadd.f32 %v354_v8, %v266_v9  ;;  %v277_v13 = vadd.f32 %v354_v8, %v276_v10  ;;  %286 = vst [vmem:[%s172_s27 + $0x8] sm:$0xff] %v272_v12  ;;  %288 = vst [vmem:[%s172_s27 + $0x18] sm:$0xff] %v282_v14 }
  0xd6   : > { %285 = vst [vmem:[%s172_s27] sm:$0xff] %v267_v11  ;;  %287 = vst [vmem:[%s172_s27 + $0x10] sm:$0xff] %v277_v13 }
  0xd7 PF: > { %s13_s12 = sadd.s32 1, %s395_s12  }
  0xd8   : > { %p10_p4 = scmp.ge.s32.totalorder %s13_s12, 4  }
  0xda   :  { %12 = sbr.rel (!%p10_p4) target bundleno = 1 (0x1), region = 62 }

// kernel: rnn_scratch_forward.3
= control target key start
LH: loop header
LB: loop body
LE: loop exit
PB: predicated region body
PF: predicated region fallthrough
CT: control target
= control target key end

     0   :  { %s831_s12 = smov 0   ;;  %s1085_s0 = inlined_call_operand.vmem [shape: f32[64,128], index: 0, kind: input, shape index: {}]   ;;  %s1086_s1 = inlined_call_operand.vmem [shape: f32[128,128], index: 1, kind: input, shape index: {}]   ;;  %s1087_s2 = inlined_call_operand.vmem [shape: f32[64,128], index: 2, kind: output, shape index: {0}]   ;;  %s1088_s3 = inlined_call_operand.vmem [shape: f32[8,128], index: 3, kind: output, shape index: {1}]  }
   0x1 LB: > { %s555_s13 = sadd.s32 4294967295, %s806_s12   ;;  %p559_p0 = scmp.ge.s32.totalorder %s806_s12, 1  ;;  %s806_s12 = sphi %s831_s12, %s14_s12  }
   0x2   : > { %p136_p1 = scmp.lt.s32.totalorder %s806_s12, 3 }
   0x4   : > { %p137_p2 = pnand %p559_p0, %p136_p1 }
   0x5   : > { %s560_s14 = sshll.u32 (!%p137_p2), %s555_s13, 2  ;;  %p564_p4 = scmp.ne.s32.totalorder (!%p137_p2), %s555_s13, 0 }
   0x6   : > { %140 = sbr.rel (%p137_p2) target bundleno = 888 (0x378), region = 28  ;;  %p161_p3 = scmp.lt.s32.totalorder (!%p137_p2), %s560_s14, 7 }
   0xb   : > { %s1090_s14 = smov (!%p161_p3, %s560_s14), 7  ;;  %175 = sbr.rel (%p564_p4) target bundleno = 18 (0x12), region = 32 }
   0xc   : > { %s561_s15 = sshll.u32 %s1090_s14, 3 }
   0xd   : > { %s842_s18 = scalar_lea.vmem %s1085_s0, %s561_s15  ;;  %s847_s21 = scalar_lea.vmem %s1087_s2, %s561_s15 }
  0x10   : > { %v808_v0 = vmov 0.0  }
  0x11   : > { %176 = vst [vmem:[%s1088_s3] sm:$0xff] %v808_v0 }
  0x12 PF: > { %v855_v1 = vld [vmem:[%s1086_s1 + $0x78] sm:$0xff]  ;;  %v809_v2 = vmov 0.0   ;;  %v861_v3 = vld [vmem:[%s1086_s1 + $0x70] sm:$0xff]  ;;  %vm810_vm0 = vmmov 0   ;;  %v871_v4 = vld [vmem:[%s1086_s1 + $0x68] sm:$0xff] }
  0x13   : > { %641 = vmatprep.subr.mxu0 %v809_v2  ;;  %673 = vmatprep.mubr.msk.f32.mxu0 %vm810_vm0, %v809_v2  ;;  %v880_v5 = vld [vmem:[%s1086_s1 + $0x60] sm:$0xff]  ;;  %v889_v6 = vld [vmem:[%s1086_s1 + $0x58] sm:$0xff]  ;;  %v898_v7 = vld [vmem:[%s1086_s1 + $0x50] sm:$0xff] }
  0x14   : > { %642 = vmatpush3.msra.mxu0 %v855_v1  ;;  %676 = vmatprep.subr.mxu1 %v809_v2  ;;  %v907_v8 = vld [vmem:[%s1086_s1 + $0x48] sm:$0xff]  ;;  %v916_v9 = vld [vmem:[%s1086_s1 + $0x40] sm:$0xff]  ;;  %v925_v10 = vld [vmem:[%s1086_s1 + $0x38] sm:$0xff] }
  0x15   : > { %643 = vmatprep.subr.mxu0 %v809_v2  ;;  %677 = vmatpush3.msra.mxu1 %v855_v1  ;;  %v934_v11 = vld [vmem:[%s1086_s1 + $0x30] sm:$0xff]  ;;  %v943_v12 = vld [vmem:[%s1086_s1 + $0x28] sm:$0xff]  ;;  %v952_v13 = vld [vmem:[%s1086_s1 + $0x20] sm:$0xff] }
  0x16   : > { %644 = vmatpush3.msra.mxu0 %v861_v3  ;;  %678 = vmatprep.subr.mxu1 %v809_v2  ;;  %v961_v14 = vld [vmem:[%s1086_s1 + $0x18] sm:$0xff]  ;;  %v970_v15 = vld [vmem:[%s1086_s1 + $0x10] sm:$0xff]  ;;  %v979_v16 = vld [vmem:[%s1086_s1 + $0x8] sm:$0xff] }
  0x17   : > { %645 = vmatprep.subr.mxu0 %v809_v2  ;;  %679 = vmatpush3.msra.mxu1 %v861_v3  ;;  %v988_v17 = vld [vmem:[%s1086_s1] sm:$0xff]  ;;  %v565_v24 = vld [vmem:[%s842_s18 + $0x8] sm:$0xff]  ;;  %v567_v29 = vld [vmem:[%s842_s18 + $0x10] sm:$0xff] }
  0x18   : > { %646 = vmatpush3.msra.mxu0 %v871_v4  ;;  %680 = vmatprep.subr.mxu1 %v809_v2  ;;  %v193_v18 = vld [vmem:[%s1088_s3] sm:$0xff]  ;;  %v569_v34 = vld [vmem:[%s842_s18 + $0x18] sm:$0xff] }
  0x19   : > { %647 = vmatprep.subr.mxu0 %v809_v2  ;;  %681 = vmatpush3.msra.mxu1 %v871_v4  ;;  %v194_v19 = vld [vmem:[%s842_s18] sm:$0xff] }
  0x1a   : > { %648 = vmatpush3.msra.mxu0 %v880_v5  ;;  %682 = vmatprep.subr.mxu1 %v809_v2 }
  0x1b   : > { %649 = vmatprep.subr.mxu0 %v809_v2  ;;  %683 = vmatpush3.msra.mxu1 %v880_v5 }
  0x1c   : > { %650 = vmatpush3.msra.mxu0 %v889_v6  ;;  %684 = vmatprep.subr.mxu1 %v809_v2 }
  0x1d   : > { %651 = vmatprep.subr.mxu0 %v809_v2  ;;  %685 = vmatpush3.msra.mxu1 %v889_v6 }
  0x1e   : > { %652 = vmatpush3.msra.mxu0 %v898_v7  ;;  %686 = vmatprep.subr.mxu1 %v809_v2 }
  0x1f   : > { %653 = vmatprep.subr.mxu0 %v809_v2  ;;  %687 = vmatpush3.msra.mxu1 %v898_v7 }
  0x20   : > { %654 = vmatpush3.msra.mxu0 %v907_v8  ;;  %688 = vmatprep.subr.mxu1 %v809_v2 }
  0x21   : > { %655 = vmatprep.subr.mxu0 %v809_v2  ;;  %689 = vmatpush3.msra.mxu1 %v907_v8 }
  0x22   : > { %656 = vmatpush3.msra.mxu0 %v916_v9  ;;  %690 = vmatprep.subr.mxu1 %v809_v2 }
  0x23   : > { %657 = vmatprep.subr.mxu0 %v809_v2  ;;  %691 = vmatpush3.msra.mxu1 %v916_v9 }
  0x24   : > { %658 = vmatpush3.msra.mxu0 %v925_v10  ;;  %692 = vmatprep.subr.mxu1 %v809_v2 }
  0x25   : > { %659 = vmatprep.subr.mxu0 %v809_v2  ;;  %693 = vmatpush3.msra.mxu1 %v925_v10 }
  0x26   : > { %660 = vmatpush3.msra.mxu0 %v934_v11  ;;  %694 = vmatprep.subr.mxu1 %v809_v2 }
  0x27   : > { %661 = vmatprep.subr.mxu0 %v809_v2  ;;  %695 = vmatpush3.msra.mxu1 %v934_v11 }
  0x28   : > { %662 = vmatpush3.msra.mxu0 %v943_v12  ;;  %696 = vmatprep.subr.mxu1 %v809_v2 }
  0x29   : > { %663 = vmatprep.subr.mxu0 %v809_v2  ;;  %697 = vmatpush3.msra.mxu1 %v943_v12 }
  0x2a   : > { %664 = vmatpush3.msra.mxu0 %v952_v13  ;;  %698 = vmatprep.subr.mxu1 %v809_v2 }
  0x2b   : > { %665 = vmatprep.subr.mxu0 %v809_v2  ;;  %699 = vmatpush3.msra.mxu1 %v952_v13 }
  0x2c   : > { %666 = vmatpush3.msra.mxu0 %v961_v14  ;;  %700 = vmatprep.subr.mxu1 %v809_v2 }
  0x2d   : > { %667 = vmatprep.subr.mxu0 %v809_v2  ;;  %701 = vmatpush3.msra.mxu1 %v961_v14 }
  0x2e   : > { %668 = vmatpush3.msra.mxu0 %v970_v15  ;;  %702 = vmatprep.subr.mxu1 %v809_v2 }
  0x2f   : > { %669 = vmatprep.subr.mxu0 %v809_v2  ;;  %703 = vmatpush3.msra.mxu1 %v970_v15 }
  0x30   : > { %670 = vmatpush3.msra.mxu0 %v979_v16  ;;  %704 = vmatprep.subr.mxu1 %v809_v2 }
  0x31   : > { %671 = vmatprep.subr.mxu0 %v809_v2  ;;  %705 = vmatpush3.msra.mxu1 %v979_v16 }
  0x32   : > { %672 = vmatpush3.msra.mxu0 %v988_v17  ;;  %706 = vmatprep.subr.mxu1 %v809_v2 }
  0x33   : > { %674 = vmatmul.mubr.f32.vlgmr.msra.gmra.mxu0 %v193_v18  ;;  %707 = vmatpush3.msra.mxu1 %v988_v17 }
  0x34   : > { %708 = vmatprep.mubr.msk.f32.mxu1 %vm810_vm0, %v809_v2  ;;  %711 = vmatprep.subr.mxu0 %v809_v2 }
  0x35   : > { %712 = vmatpush3.msra.mxu0 %v855_v1  ;;  %743 = vmatprep.mubr.msk.f32.mxu0 %vm810_vm0, %v809_v2 }
  0x36   : > { %713 = vmatprep.subr.mxu0 %v809_v2  ;;  %746 = vmatprep.subr.mxu1 %v809_v2 }
  0x37   : > { %714 = vmatpush3.msra.mxu0 %v861_v3 }
  0x38   : > { %715 = vmatprep.subr.mxu0 %v809_v2 }
  0x39   : > { %716 = vmatpush3.msra.mxu0 %v871_v4 }
  0x3a   : > { %717 = vmatprep.subr.mxu0 %v809_v2 }
  0x3b   : > { %718 = vmatpush3.msra.mxu0 %v880_v5 }
  0x3c   : > { %719 = vmatprep.subr.mxu0 %v809_v2 }
  0x3d   : > { %720 = vmatpush3.msra.mxu0 %v889_v6 }
  0x3e   : > { %721 = vmatprep.subr.mxu0 %v809_v2 }
  0x3f   : > { %722 = vmatpush3.msra.mxu0 %v898_v7 }
  0x40   : > { %723 = vmatprep.subr.mxu0 %v809_v2 }
  0x41   : > { %724 = vmatpush3.msra.mxu0 %v907_v8 }
  0x42   : > { %725 = vmatprep.subr.mxu0 %v809_v2 }
  0x43   : > { %726 = vmatpush3.msra.mxu0 %v916_v9 }
  0x44   : > { %727 = vmatprep.subr.mxu0 %v809_v2 }
  0x45   : > { %728 = vmatpush3.msra.mxu0 %v925_v10 }
  0x46   : > { %729 = vmatprep.subr.mxu0 %v809_v2 }
  0x47   : > { %730 = vmatpush3.msra.mxu0 %v934_v11 }
  0x48   : > { %731 = vmatprep.subr.mxu0 %v809_v2 }
  0x49   : > { %732 = vmatpush3.msra.mxu0 %v943_v12 }
  0x4a   : > { %733 = vmatprep.subr.mxu0 %v809_v2 }
  0x4b   : > { %734 = vmatpush3.msra.mxu0 %v952_v13 }
  0x4c   : > { %735 = vmatprep.subr.mxu0 %v809_v2 }
  0x4d   : > { %736 = vmatpush3.msra.mxu0 %v961_v14 }
  0x4e   : > { %737 = vmatprep.subr.mxu0 %v809_v2 }
  0x4f   : > { %738 = vmatpush3.msra.mxu0 %v970_v15 }
  0x50   : > { %739 = vmatprep.subr.mxu0 %v809_v2 }
  0x51   : > { %740 = vmatpush3.msra.mxu0 %v979_v16 }
  0x52   : > { %741 = vmatprep.subr.mxu0 %v809_v2 }
  0x53   : > { %742 = vmatpush3.msra.mxu0 %v988_v17 }
  0xf3   : > { %v261_v20 = vpop.f32.mrf.mxu0 }
  0xf4   : > { %v262_v21 = vadd.f32 %v261_v20, %v194_v19 }
  0xf5   : > { %v675_v22 = vpop.f32.mrf.mxu0 }
  0xf6   : > { %792 = vtanh.f32 %v262_v21 }
 0x103   : > { %v793_v23 = vpop.eup %792 }
 0x104   : > { %266 = vst [vmem:[%s847_s21] sm:$0xff] %v793_v23  ;;  %709 = vmatmul.mubr.f32.vlgmr.msra.gmra.mxu1 %v793_v23 }
 0x105   : > { %747 = vmatpush3.msra.mxu1 %v855_v1  ;;  %778 = vmatprep.mubr.msk.f32.mxu1 %vm810_vm0, %v809_v2 }
 0x106   : > { %748 = vmatprep.subr.mxu1 %v809_v2 }
 0x107   : > { %749 = vmatpush3.msra.mxu1 %v861_v3 }
 0x108   : > { %750 = vmatprep.subr.mxu1 %v809_v2 }
 0x109   : > { %751 = vmatpush3.msra.mxu1 %v871_v4 }
 0x10a   : > { %752 = vmatprep.subr.mxu1 %v809_v2 }
 0x10b   : > { %753 = vmatpush3.msra.mxu1 %v880_v5 }
 0x10c   : > { %754 = vmatprep.subr.mxu1 %v809_v2 }
 0x10d   : > { %755 = vmatpush3.msra.mxu1 %v889_v6 }
 0x10e   : > { %756 = vmatprep.subr.mxu1 %v809_v2 }
 0x10f   : > { %757 = vmatpush3.msra.mxu1 %v898_v7 }
 0x110   : > { %758 = vmatprep.subr.mxu1 %v809_v2 }
 0x111   : > { %759 = vmatpush3.msra.mxu1 %v907_v8 }
 0x112   : > { %760 = vmatprep.subr.mxu1 %v809_v2 }
 0x113   : > { %761 = vmatpush3.msra.mxu1 %v916_v9 }
 0x114   : > { %762 = vmatprep.subr.mxu1 %v809_v2 }
 0x115   : > { %763 = vmatpush3.msra.mxu1 %v925_v10 }
 0x116   : > { %764 = vmatprep.subr.mxu1 %v809_v2 }
 0x117   : > { %765 = vmatpush3.msra.mxu1 %v934_v11 }
 0x118   : > { %766 = vmatprep.subr.mxu1 %v809_v2 }
 0x119   : > { %767 = vmatpush3.msra.mxu1 %v943_v12 }
 0x11a   : > { %768 = vmatprep.subr.mxu1 %v809_v2 }
 0x11b   : > { %769 = vmatpush3.msra.mxu1 %v952_v13 }
 0x11c   : > { %770 = vmatprep.subr.mxu1 %v809_v2 }
 0x11d   : > { %771 = vmatpush3.msra.mxu1 %v961_v14 }
 0x11e   : > { %772 = vmatprep.subr.mxu1 %v809_v2 }
 0x11f   : > { %773 = vmatpush3.msra.mxu1 %v970_v15 }
 0x120   : > { %774 = vmatprep.subr.mxu1 %v809_v2 }
 0x121   : > { %775 = vmatpush3.msra.mxu1 %v979_v16 }
 0x122   : > { %776 = vmatprep.subr.mxu1 %v809_v2 }
 0x123   : > { %777 = vmatpush3.msra.mxu1 %v988_v17 }
 0x1c4   : > { %v335_v25 = vpop.f32.mrf.mxu1 }
 0x1c5   : > { %v336_v26 = vadd.f32 %v565_v24, %v335_v25 }
 0x1c6   : > { %v710_v27 = vpop.f32.mrf.mxu1 }
 0x1c7   : > { %794 = vtanh.f32 %v336_v26 }
 0x1d4   : > { %v795_v28 = vpop.eup %794 }
 0x1d5   : > { %566 = vst [vmem:[%s847_s21 + $0x8] sm:$0xff] %v795_v28  ;;  %744 = vmatmul.mubr.f32.vlgmr.msra.gmra.mxu0 %v795_v28 }
 0x295   : > { %v410_v30 = vpop.f32.mrf.mxu0 }
 0x296   : > { %v411_v31 = vadd.f32 %v567_v29, %v410_v30 }
 0x297   : > { %v745_v32 = vpop.f32.mrf.mxu0 }
 0x298   : > { %796 = vtanh.f32 %v411_v31 }
 0x2a5   : > { %v797_v33 = vpop.eup %796 }
 0x2a6   : > { %568 = vst [vmem:[%s847_s21 + $0x10] sm:$0xff] %v797_v33  ;;  %779 = vmatmul.mubr.f32.vlgmr.msra.gmra.mxu1 %v797_v33 }
 0x366   : > { %v485_v35 = vpop.f32.mrf.mxu1 }
 0x367   : > { %v486_v36 = vadd.f32 %v569_v34, %v485_v35 }
 0x368   : > { %v780_v37 = vpop.f32.mrf.mxu1 }
 0x369   : > { %798 = vtanh.f32 %v486_v36 }
 0x376   : > { %v799_v38 = vpop.eup %798 }
 0x377   : > { %570 = vst [vmem:[%s847_s21 + $0x18] sm:$0xff] %v799_v38  ;;  %492 = vst [vmem:[%s1088_s3] sm:$0xff] %v799_v38 }
 0x378 PF: > { %s14_s12 = sadd.s32 1, %s806_s12  }
 0x379   : > { %p11_p5 = scmp.ge.s32.totalorder %s14_s12, 4  }
 0x37b   :  { %13 = sbr.rel (!%p11_p5) target bundleno = 1 (0x1), region = 76 }

</bundles_post_ra>
